<compile_context>
chip_gen: v6e
topology: v6e:2x2x1
jax: 0.10.0
libtpu: 0.0.40
codegen_flags: <defaults>
</compile_context>

<pallas_src>
import jax
import jax.numpy as jnp
from jax.experimental import pallas as pl
from jax.experimental.pallas import tpu as pltpu


def nll_kernel(y_col_ref, risk_col_ref, e_col_ref, y_row_ref, expr_row_ref,
               contrib_ref, num_acc, den_acc):
    j = pl.program_id(1)

    @pl.when(j == 0)
    def _init():
        num_acc[...] = jnp.zeros_like(num_acc)
        den_acc[...] = jnp.zeros_like(den_acc)

    y_col = y_col_ref[...]          # (TM, 1)   event time of each output row
    y_row = y_row_ref[...]          # (1, TN)   event time of the summed index
    expr = expr_row_ref[...]        # (1, TN)   exp(risk - max_risk), precomputed in glue

    # Fuse mask build + reduction; fold TN lanes into 128-wide accumulators with
    # VPU adds so the XLU reduce runs only once per row block (in _finalize).
    tn = y_row.shape[1]
    num_fold = num_acc[...]
    den_fold = den_acc[...]
    for k in range(tn // 128):
        sl = slice(k * 128, (k + 1) * 128)
        # keep iff NOT (y_col - y_row > 0)  ==  (y_col <= y_row); ties kept.
        keep = y_col <= y_row[:, sl]                          # (TM, 128)
        num_fold = num_fold + jnp.where(keep, expr[:, sl], 0.0)
        den_fold = den_fold + jnp.where(keep, 1.0, 0.0)
    num_acc[...] = num_fold
    den_acc[...] = den_fold

    @pl.when(j == pl.num_programs(1) - 1)
    def _finalize():
        num = jnp.sum(num_acc[...], axis=-1, keepdims=True)   # (TM, 1)
        den = jnp.sum(den_acc[...], axis=-1, keepdims=True)   # (TM, 1)
        log_loss = jnp.log(num / den)       # shifted by -max_risk, same as risk_col
        contrib_ref[...] = ((risk_col_ref[...] - log_loss)
                            * e_col_ref[...]).astype(contrib_ref.dtype)


def _round_up(x, m):
    return (x + m - 1) // m * m


def negative_log_likelihood(risk_pred, y, e, model_weights, weight_decay=0.0):
    """Matches NegativeLogLikelihood.forward (the module hard-codes L2_reg = 0)."""
    n = risk_pred.shape[0]
    risk = risk_pred.astype(jnp.float32).reshape(n, 1)
    y = y.astype(jnp.float32).reshape(n, 1)
    e = e.astype(jnp.float32).reshape(n, 1)

    # Max-shift stabilization:
    #   log(sum exp(r)*m / sum m) == log(sum exp(r-c)*m / sum m) + c
    #   and (r - log_loss) == ((r-c) - shifted_log_loss) -> identical loss, no overflow.
    shift = jnp.max(risk)
    risk_shift = risk - shift
    expr = jnp.exp(risk_shift)              # exp hoisted out of the kernel: O(N) EUP work

    # Tile sizes / padding (block shapes must respect the (8, 128) rule).
    n_pad = _round_up(n, 128)
    tn = next(t for t in (512, 256, 128) if n_pad % t == 0)
    tm = 256 if n_pad % 256 == 0 else 128
    pad = n_pad - n

    # Padded lanes: y = -inf  -> excluded from every real row's num AND den.
    # Padded rows:  e = 0 (and finite risk/log_loss) -> contribute exactly 0.
    y_col = jnp.pad(y, ((0, pad), (0, 0)), constant_values=-jnp.inf)
    risk_col = jnp.pad(risk_shift, ((0, pad), (0, 0)))
    e_col = jnp.pad(e, ((0, pad), (0, 0)))
    y_row = y_col.reshape(1, n_pad)
    expr_row = jnp.pad(expr, ((0, pad), (0, 0))).reshape(1, n_pad)

    grid = (n_pad // tm, n_pad // tn)
    contrib = pl.pallas_call(
        nll_kernel,
        out_shape=jax.ShapeDtypeStruct((n_pad, 1), jnp.float32),
        grid_spec=pltpu.PrefetchScalarGridSpec(
            num_scalar_prefetch=0,
            grid=grid,
            in_specs=[
                pl.BlockSpec((tm, 1), lambda i, j: (i, 0)),   # y (column view)
                pl.BlockSpec((tm, 1), lambda i, j: (i, 0)),   # risk - max (column view)
                pl.BlockSpec((tm, 1), lambda i, j: (i, 0)),   # e (column view)
                pl.BlockSpec((1, tn), lambda i, j: (0, j)),   # y (row view)
                pl.BlockSpec((1, tn), lambda i, j: (0, j)),   # exp(risk - max) (row view)
            ],
            out_specs=pl.BlockSpec((tm, 1), lambda i, j: (i, 0)),
            scratch_shapes=[pltpu.VMEM((tm, 128), jnp.float32),   # num accumulator
                            pltpu.VMEM((tm, 128), jnp.float32)],  # den accumulator
        ),
        compiler_params=pltpu.CompilerParams(
            dimension_semantics=("parallel", "arbitrary"),
            vmem_limit_bytes=32 * 1024 * 1024,
        ),
    )(y_col, risk_col, e_col, y_row, expr_row)

    # Tiny final reductions in glue (padded rows contribute 0).
    # NOTE: sum(e) == 0 (no events) yields nan, same as the PyTorch reference.
    neg_log_loss = -jnp.sum(contrib) / jnp.sum(e)

    # Regularization(order=2, weight_decay=0.0): exactly zero in the module;
    # kept as plain-JAX glue for semantic fidelity.
    l2_loss = weight_decay * sum(jnp.linalg.norm(w.astype(jnp.float32))
                                 for w in model_weights)
    return neg_log_loss + l2_loss


def ref_nll(risk_pred, y, e):
    """Pure-JAX reference, literal transcription of the PyTorch forward."""
    n = y.shape[0]
    mask = jnp.ones((n, n), jnp.float32)
    mask = jnp.where((y.T - y) > 0, 0.0, mask)
    log_loss = jnp.exp(risk_pred) * mask
    log_loss = jnp.sum(log_loss, axis=0) / jnp.sum(mask, axis=0)
    log_loss = jnp.log(log_loss).reshape(-1, 1)
    return -jnp.sum((risk_pred - log_loss) * e) / jnp.sum(e)


if __name__ == "__main__":
    HIDDEN = 32    # synthetic model width (only feeds the zero-weighted L2 term)
    key = jax.random.PRNGKey(0)

    # N=8: tiny batch (grid (1,1)); N=300: exercises padding and a multi-block grid.
    for N in (8, 300):
        k_risk, k_y, k_e, k_w, key = jax.random.split(key, 5)
        risk_pred = jax.random.normal(k_risk, (N, 1), dtype=jnp.float32)
        y = jax.random.uniform(k_y, (N, 1), dtype=jnp.float32, minval=0.0, maxval=10.0)
        e = (jax.random.uniform(k_e, (N, 1)) > 0.4).astype(jnp.float32)
        e = e.at[0, 0].set(1.0)  # ensure at least one event so sum(e) > 0

        # Deterministic synthetic "model" parameters (shapes of a Linear(HIDDEN, 1)).
        model_weights = [jax.random.normal(k_w, (1, HIDDEN), dtype=jnp.float32) * 0.1]

        loss = negative_log_likelihood(risk_pred, y, e, model_weights,
                                       weight_decay=0.0)
        loss = jax.block_until_ready(loss)

        expected = ref_nll(risk_pred, y, e)
        if not jnp.allclose(loss, expected, rtol=1e-5, atol=1e-5):
            raise AssertionError(f"N={N}: mismatch kernel={loss} ref={expected}")

    print("KERNEL_OK")
</pallas_src>

<mosaic_0001>
module attributes {stable_mosaic.version = 11 : i64} {
  func.func @nll_kernel(%arg0: i32, %arg1: i32, %arg2: memref<128x1xf32, #tpu.memory_space<vmem>>, %arg3: memref<128x1xf32, #tpu.memory_space<vmem>>, %arg4: memref<128x1xf32, #tpu.memory_space<vmem>>, %arg5: memref<1x128xf32, #tpu.memory_space<vmem>>, %arg6: memref<1x128xf32, #tpu.memory_space<vmem>>, %arg7: memref<128x1xf32, #tpu.memory_space<vmem>>, %arg8: memref<128x128xf32, #tpu.memory_space<vmem>>, %arg9: memref<128x128xf32, #tpu.memory_space<vmem>>) attributes {dimension_semantics = [#tpu.dimension_semantics<parallel>, #tpu.dimension_semantics<arbitrary>], iteration_bounds = array<i64: 1, 1>, scalar_prefetch = 0 : i64, scratch_operands = 2 : i64, tpu.core_type = #tpu.core_type<tc>, window_params = [{transform_indices = @transform_0, window_bounds = array<i64: 128, 1>}, {transform_indices = @transform_1, window_bounds = array<i64: 128, 1>}, {transform_indices = @transform_2, window_bounds = array<i64: 128, 1>}, {transform_indices = @transform_3, window_bounds = array<i64: 1, 128>}, {transform_indices = @transform_4, window_bounds = array<i64: 1, 128>}, {transform_indices = @transform_5, window_bounds = array<i64: 128, 1>}]} {
    %c0_i32 = arith.constant 0 : i32
    %0 = arith.cmpi eq, %arg1, %c0_i32 : i32
    %1 = arith.extui %0 : i1 to i32
    %c0_i32_0 = arith.constant 0 : i32
    %2 = arith.cmpi ne, %1, %c0_i32_0 : i32
    scf.if %2 {
      %cst_18 = arith.constant 0.000000e+00 : f32
      %25 = vector.broadcast %cst_18 : f32 to vector<128x128xf32>
      %c0_19 = arith.constant 0 : index
      %c0_20 = arith.constant 0 : index
      %26 = vector.load %arg8[%c0_19, %c0_20] : memref<128x128xf32, #tpu.memory_space<vmem>>, vector<128x128xf32>
      tpu.vector_store %arg8[%c0_19, %c0_20], %25 {strides = array<i32>} : memref<128x128xf32, #tpu.memory_space<vmem>>, vector<128x128xf32>,
      %cst_21 = arith.constant 0.000000e+00 : f32
      %27 = vector.broadcast %cst_21 : f32 to vector<128x128xf32>
      %c0_22 = arith.constant 0 : index
      %c0_23 = arith.constant 0 : index
      %28 = vector.load %arg9[%c0_22, %c0_23] : memref<128x128xf32, #tpu.memory_space<vmem>>, vector<128x128xf32>
      tpu.vector_store %arg9[%c0_22, %c0_23], %27 {strides = array<i32>} : memref<128x128xf32, #tpu.memory_space<vmem>>, vector<128x128xf32>,
    } else {
    }
    %c0 = arith.constant 0 : index
    %c0_1 = arith.constant 0 : index
    %3 = vector.load %arg2[%c0, %c0_1] : memref<128x1xf32, #tpu.memory_space<vmem>>, vector<128x1xf32>
    %c0_2 = arith.constant 0 : index
    %c0_3 = arith.constant 0 : index
    %4 = vector.load %arg5[%c0_2, %c0_3] : memref<1x128xf32, #tpu.memory_space<vmem>>, vector<1x128xf32>
    %c0_4 = arith.constant 0 : index
    %c0_5 = arith.constant 0 : index
    %5 = vector.load %arg6[%c0_4, %c0_5] : memref<1x128xf32, #tpu.memory_space<vmem>>, vector<1x128xf32>
    %c0_6 = arith.constant 0 : index
    %c0_7 = arith.constant 0 : index
    %6 = vector.load %arg8[%c0_6, %c0_7] : memref<128x128xf32, #tpu.memory_space<vmem>>, vector<128x128xf32>
    %c0_8 = arith.constant 0 : index
    %c0_9 = arith.constant 0 : index
    %7 = vector.load %arg9[%c0_8, %c0_9] : memref<128x128xf32, #tpu.memory_space<vmem>>, vector<128x128xf32>
    %8 = vector.broadcast %3 : vector<128x1xf32> to vector<128x128xf32>
    %9 = vector.broadcast %4 : vector<1x128xf32> to vector<128x128xf32>
    %10 = arith.cmpf ole, %8, %9 : vector<128x128xf32>
    %cst = arith.constant 0.000000e+00 : f32
    %11 = vector.shape_cast %5 : vector<1x128xf32> to vector<1x128xf32>
    %12 = vector.broadcast %11 : vector<1x128xf32> to vector<128x128xf32>
    %13 = vector.broadcast %cst : f32 to vector<128x128xf32>
    %14 = arith.select %10, %12, %13 : vector<128x128xi1>, vector<128x128xf32>
    %15 = arith.addf %6, %14 : vector<128x128xf32>
    %cst_10 = arith.constant 1.000000e+00 : f32
    %cst_11 = arith.constant 0.000000e+00 : f32
    %16 = vector.broadcast %cst_10 : f32 to vector<128x128xf32>
    %17 = vector.broadcast %cst_11 : f32 to vector<128x128xf32>
    %18 = arith.select %10, %16, %17 : vector<128x128xi1>, vector<128x128xf32>
    %19 = arith.addf %7, %18 : vector<128x128xf32>
    %c0_12 = arith.constant 0 : index
    %c0_13 = arith.constant 0 : index
    %20 = vector.load %arg8[%c0_12, %c0_13] : memref<128x128xf32, #tpu.memory_space<vmem>>, vector<128x128xf32>
    tpu.vector_store %arg8[%c0_12, %c0_13], %15 {strides = array<i32>} : memref<128x128xf32, #tpu.memory_space<vmem>>, vector<128x128xf32>,
    %c0_14 = arith.constant 0 : index
    %c0_15 = arith.constant 0 : index
    %21 = vector.load %arg9[%c0_14, %c0_15] : memref<128x128xf32, #tpu.memory_space<vmem>>, vector<128x128xf32>
    tpu.vector_store %arg9[%c0_14, %c0_15], %19 {strides = array<i32>} : memref<128x128xf32, #tpu.memory_space<vmem>>, vector<128x128xf32>,
    %c0_i32_16 = arith.constant 0 : i32
    %22 = arith.cmpi eq, %arg1, %c0_i32_16 : i32
    %23 = arith.extui %22 : i1 to i32
    %c0_i32_17 = arith.constant 0 : i32
    %24 = arith.cmpi ne, %23, %c0_i32_17 : i32
    scf.if %24 {
      %c0_18 = arith.constant 0 : index
      %c0_19 = arith.constant 0 : index
      %25 = vector.load %arg8[%c0_18, %c0_19] : memref<128x128xf32, #tpu.memory_space<vmem>>, vector<128x128xf32>
      %cst_20 = arith.constant dense<0.000000e+00> : vector<128xf32>
      %26 = vector.multi_reduction <add>, %25, %cst_20 [1] : vector<128x128xf32> to vector<128xf32>
      %27 = vector.shape_cast %26 : vector<128xf32> to vector<128x1xf32>
      %c0_21 = arith.constant 0 : index
      %c0_22 = arith.constant 0 : index
      %28 = vector.load %arg9[%c0_21, %c0_22] : memref<128x128xf32, #tpu.memory_space<vmem>>, vector<128x128xf32>
      %cst_23 = arith.constant dense<0.000000e+00> : vector<128xf32>
      %29 = vector.multi_reduction <add>, %28, %cst_23 [1] : vector<128x128xf32> to vector<128xf32>
      %30 = vector.shape_cast %29 : vector<128xf32> to vector<128x1xf32>
      %31 = arith.divf %27, %30 : vector<128x1xf32>
      %32 = math.log %31 : vector<128x1xf32>
      %c0_24 = arith.constant 0 : index
      %c0_25 = arith.constant 0 : index
      %33 = vector.load %arg3[%c0_24, %c0_25] : memref<128x1xf32, #tpu.memory_space<vmem>>, vector<128x1xf32>
      %34 = arith.subf %33, %32 : vector<128x1xf32>
      %c0_26 = arith.constant 0 : index
      %c0_27 = arith.constant 0 : index
      %35 = vector.load %arg4[%c0_26, %c0_27] : memref<128x1xf32, #tpu.memory_space<vmem>>, vector<128x1xf32>
      %36 = arith.mulf %34, %35 : vector<128x1xf32>
      %c0_28 = arith.constant 0 : index
      %c0_29 = arith.constant 0 : index
      %37 = vector.load %arg7[%c0_28, %c0_29] : memref<128x1xf32, #tpu.memory_space<vmem>>, vector<128x1xf32>
      tpu.vector_store %arg7[%c0_28, %c0_29], %36 {strides = array<i32>} : memref<128x1xf32, #tpu.memory_space<vmem>>, vector<128x1xf32>,
    } else {
    }
    return
  }
  func.func @transform_0(%arg0: i32, %arg1: i32) -> (i32, i32) {
    %c0_i32 = arith.constant 0 : i32
    %c0_i32_0 = arith.constant 0 : i32
    return %arg0, %c0_i32 : i32, i32
  }
  func.func @transform_1(%arg0: i32, %arg1: i32) -> (i32, i32) {
    %c0_i32 = arith.constant 0 : i32
    %c0_i32_0 = arith.constant 0 : i32
    return %arg0, %c0_i32 : i32, i32
  }
  func.func @transform_2(%arg0: i32, %arg1: i32) -> (i32, i32) {
    %c0_i32 = arith.constant 0 : i32
    %c0_i32_0 = arith.constant 0 : i32
    return %arg0, %c0_i32 : i32, i32
  }
  func.func @transform_3(%arg0: i32, %arg1: i32) -> (i32, i32) {
    %c0_i32 = arith.constant 0 : i32
    %c0_i32_0 = arith.constant 0 : i32
    return %c0_i32, %arg1 : i32, i32
  }
  func.func @transform_4(%arg0: i32, %arg1: i32) -> (i32, i32) {
    %c0_i32 = arith.constant 0 : i32
    %c0_i32_0 = arith.constant 0 : i32
    return %c0_i32, %arg1 : i32, i32
  }
  func.func @transform_5(%arg0: i32, %arg1: i32) -> (i32, i32) {
    %c0_i32 = arith.constant 0 : i32
    %c0_i32_0 = arith.constant 0 : i32
    return %arg0, %c0_i32 : i32, i32
  }
}

</mosaic_0001>

<bundles_post_ra>
// kernel: tpu_custom_call.1
= control target key start
LH: loop header
LB: loop body
LE: loop exit
PB: predicated region body
PF: predicated region fallthrough
CT: control target
= control target key end

     0   :  { %v628_v0 = vmov 0   ;;  %v629_v20 = vmov 0.0   ;;  %s976_s0 = inlined_call_operand.vmem [shape: f32[128,1], index: 0, kind: input, shape index: {}]   ;;  %s977_s3 = inlined_call_operand.vmem [shape: f32[1,128], index: 3, kind: input, shape index: {}]   ;;  %s978_s4 = inlined_call_operand.vmem [shape: f32[1,128], index: 4, kind: input, shape index: {}]   ;;  %s979_s1 = inlined_call_operand.vmem [shape: f32[128,1], index: 1, kind: input, shape index: {}]   ;;  %s980_s2 = inlined_call_operand.vmem [shape: f32[128,1], index: 2, kind: input, shape index: {}]   ;;  %s981_s5 = inlined_call_operand.vmem [shape: f32[128,1], index: 5, kind: output, shape index: {}]  }
   0x1   :  { %563 = vset.pattern.permute.xlu1 %v628_v0  ;;  %562 = vset.pattern.permute.xlu0 %v628_v0  ;;  %v58_v1 = vld [vmem:[%s976_s0 + $0x10] sm:$0xff]  ;;  %v56_v2 = vld [vmem:[%s976_s0] sm:$0xff]  ;;  %v59_v3 = vld [vmem:[%s976_s0 + $0x18] sm:$0xff] }
   0x2   :  { %118 = vperm.xlu1 %563, %v58_v1   ;;  %108 = vperm.xlu0 %562, %v56_v2   ;;  %v57_v4 = vld [vmem:[%s976_s0 + $0x8] sm:$0xff]  ;;  %v60_v6 = vld [vmem:[%s976_s0 + $0x20] sm:$0xff]  ;;  %v63_v7 = vld [vmem:[%s976_s0 + $0x38] sm:$0xff] }
   0x3   :  { %v61_v5 = vld [vmem:[%s976_s0 + $0x28] sm:$0xff]  ;;  %v62_v8 = vld [vmem:[%s976_s0 + $0x30] sm:$0xff]  ;;  %v64_v10 = vld [vmem:[%s976_s0 + $0x40] sm:$0xff] }
   0x4   :  { %v65_v9 = vld [vmem:[%s976_s0 + $0x48] sm:$0xff]  ;;  %v67_v11 = vld [vmem:[%s976_s0 + $0x58] sm:$0xff]  ;;  %v66_v12 = vld [vmem:[%s976_s0 + $0x50] sm:$0xff] }
   0x5   :  { %v69_v13 = vld [vmem:[%s976_s0 + $0x68] sm:$0xff]  ;;  %v68_v14 = vld [vmem:[%s976_s0 + $0x60] sm:$0xff]  ;;  %v71_v15 = vld [vmem:[%s976_s0 + $0x78] sm:$0xff] }
   0x6   :  { %123 = vperm.xlu1 %563, %v59_v3   ;;  %113 = vperm.xlu0 %562, %v57_v4   ;;  %v70_v16 = vld [vmem:[%s976_s0 + $0x70] sm:$0xff]  ;;  %v711_v17 = vld [vmem:[%s977_s3] ss:$0 sm:$0xff] }
   0x7   :  { %v559_v50 = vld [vmem:[%s978_s4] ss:$0 sm:$0xff] }
   0xa   :  { %133 = vperm.xlu1 %563, %v61_v5   ;;  %128 = vperm.xlu0 %562, %v60_v6  }
   0xe   :  { %143 = vperm.xlu1 %563, %v63_v7   ;;  %138 = vperm.xlu0 %562, %v62_v8  }
  0x12   :  { %153 = vperm.xlu1 %563, %v65_v9   ;;  %148 = vperm.xlu0 %562, %v64_v10  }
  0x16   :  { %163 = vperm.xlu1 %563, %v67_v11   ;;  %158 = vperm.xlu0 %562, %v66_v12  }
  0x1a   :  { %173 = vperm.xlu1 %563, %v69_v13   ;;  %168 = vperm.xlu0 %562, %v68_v14  }
  0x1e   :  { %183 = vperm.xlu1 %563, %v71_v15   ;;  %178 = vperm.xlu0 %562, %v70_v16  }
  0x7d   :  { %v713_v18 = vpop.permute.xlu1 %118  ;;  %v715_v19 = vpop.permute.xlu0 %108 }
  0x7e   :  { %vm194_vm0 = vcmp.le.f32.partialorder %v713_v18, %v711_v17  ;;  %vm192_vm1 = vcmp.le.f32.partialorder %v715_v19, %v711_v17 }
  0x7f   :  { %v246_v21 = vsel %vm192_vm1, 1.0, %v629_v20  ;;  %v248_v24 = vsel %vm194_vm0, 1.0, %v629_v20  ;;  %v214_v52 = vsel %vm192_vm1, %v559_v50, 0.0  ;;  %v216_v54 = vsel %vm194_vm0, %v559_v50, 0.0 }
  0x80   :  { %377 = vadd.xlane.f32.xlu0 %v246_v21  ;;  %vm537_vm0 = vcmask 7168  }
  0x81   :  { %v724_v22 = vpop.permute.xlu1 %123  ;;  %v114_v23 = vpop.permute.xlu0 %113 }
  0x82   :  { %vm193_vm2 = vcmp.le.f32.partialorder %v114_v23, %v711_v17  ;;  %vm195_vm3 = vcmp.le.f32.partialorder %v724_v22, %v711_v17 }
  0x83   :  { %v247_v25 = vsel %vm193_vm2, 1.0, %v629_v20  ;;  %v249_v28 = vsel %vm195_vm3, 1.0, %v629_v20  ;;  %v215_v53 = vsel %vm193_vm2, %v559_v50, 0.0  ;;  %v217_v55 = vsel %vm195_vm3, %v559_v50, 0.0 }
  0x84   :  { %381 = vadd.xlane.f32.xlu0 %v248_v24  ;;  %379 = vadd.xlane.f32.xlu1 %v247_v25 }
  0x85   :  { %v734_v26 = vpop.permute.xlu1 %133  ;;  %v129_v27 = vpop.permute.xlu0 %128 }
  0x86   :  { %vm196_vm4 = vcmp.le.f32.partialorder %v129_v27, %v711_v17  ;;  %vm197_vm5 = vcmp.le.f32.partialorder %v734_v26, %v711_v17 }
  0x87   :  { %v250_v29 = vsel %vm196_vm4, 1.0, %v629_v20  ;;  %v251_v32 = vsel %vm197_vm5, 1.0, %v629_v20  ;;  %v218_v56 = vsel %vm196_vm4, %v559_v50, 0.0  ;;  %v219_v57 = vsel %vm197_vm5, %v559_v50, 0.0 }
  0x88   :  { %383 = vadd.xlane.f32.xlu0 %v249_v28  ;;  %385 = vadd.xlane.f32.xlu1 %v250_v29 }
  0x89   :  { %v144_v30 = vpop.permute.xlu1 %143  ;;  %v139_v31 = vpop.permute.xlu0 %138 }
  0x8a   :  { %vm198_vm6 = vcmp.le.f32.partialorder %v139_v31, %v711_v17  ;;  %vm199_vm7 = vcmp.le.f32.partialorder %v144_v30, %v711_v17 }
  0x8b   :  { %v252_v33 = vsel %vm198_vm6, 1.0, %v629_v20  ;;  %v253_v36 = vsel %vm199_vm7, 1.0, %v629_v20  ;;  %v220_v58 = vsel %vm198_vm6, %v559_v50, 0.0  ;;  %v221_v59 = vsel %vm199_vm7, %v559_v50, 0.0 }
  0x8c   :  { %387 = vadd.xlane.f32.xlu0 %v251_v32  ;;  %389 = vadd.xlane.f32.xlu1 %v252_v33 }
  0x8d   :  { %v154_v34 = vpop.permute.xlu1 %153  ;;  %v149_v35 = vpop.permute.xlu0 %148 }
  0x8e   :  { %vm200_vm8 = vcmp.le.f32.partialorder %v149_v35, %v711_v17  ;;  %vm201_vm9 = vcmp.le.f32.partialorder %v154_v34, %v711_v17 }
  0x8f   :  { %v254_v37 = vsel %vm200_vm8, 1.0, %v629_v20  ;;  %v255_v40 = vsel %vm201_vm9, 1.0, %v629_v20  ;;  %v222_v60 = vsel %vm200_vm8, %v559_v50, 0.0  ;;  %v223_v61 = vsel %vm201_vm9, %v559_v50, 0.0 }
  0x90   :  { %391 = vadd.xlane.f32.xlu0 %v253_v36  ;;  %393 = vadd.xlane.f32.xlu1 %v254_v37 }
  0x91   :  { %v164_v38 = vpop.permute.xlu1 %163  ;;  %v159_v39 = vpop.permute.xlu0 %158 }
  0x92   :  { %vm202_vm10 = vcmp.le.f32.partialorder %v159_v39, %v711_v17  ;;  %vm203_vm11 = vcmp.le.f32.partialorder %v164_v38, %v711_v17 }
  0x93   :  { %v256_v41 = vsel %vm202_vm10, 1.0, %v629_v20  ;;  %v257_v44 = vsel %vm203_vm11, 1.0, %v629_v20  ;;  %v224_v62 = vsel %vm202_vm10, %v559_v50, 0.0  ;;  %v225_v63 = vsel %vm203_vm11, %v559_v50, 0.0 }
  0x94   :  { %395 = vadd.xlane.f32.xlu0 %v255_v40  ;;  %397 = vadd.xlane.f32.xlu1 %v256_v41 }
  0x95   :  { %v174_v42 = vpop.permute.xlu1 %173  ;;  %v169_v43 = vpop.permute.xlu0 %168 }
  0x96   :  { %vm204_vm12 = vcmp.le.f32.partialorder %v169_v43, %v711_v17  ;;  %vm205_vm13 = vcmp.le.f32.partialorder %v174_v42, %v711_v17 }
  0x97   :  { %v258_v45 = vsel %vm204_vm12, 1.0, %v629_v20  ;;  %v259_v48 = vsel %vm205_vm13, 1.0, %v629_v20  ;;  %v226_v0 = vsel %vm204_vm12, %v559_v50, 0.0  ;;  %v227_v1 = vsel %vm205_vm13, %v559_v50, 0.0 }
  0x98   :  { %399 = vadd.xlane.f32.xlu0 %v257_v44  ;;  %401 = vadd.xlane.f32.xlu1 %v258_v45  ;;  %v473_v44 = vld [vmem:[%s979_s1] sm:$0xff] }
  0x99   :  { %v184_v46 = vpop.permute.xlu1 %183  ;;  %v179_v47 = vpop.permute.xlu0 %178 }
  0x9a   :  { %vm206_vm14 = vcmp.le.f32.partialorder %v179_v47, %v711_v17  ;;  %vm207_vm15 = vcmp.le.f32.partialorder %v184_v46, %v711_v17 }
  0x9b   :  { %v260_v49 = vsel %vm206_vm14, 1.0, %v629_v20  ;;  %v261_v51 = vsel %vm207_vm15, 1.0, %v629_v20  ;;  %v228_v2 = vsel %vm206_vm14, %v559_v50, 0.0  ;;  %v229_v3 = vsel %vm207_vm15, %v559_v50, 0.0 }
  0x9c   :  { %403 = vadd.xlane.f32.xlu0 %v259_v48  ;;  %405 = vadd.xlane.f32.xlu1 %v260_v49 }
  0xa0   :  { %407 = vadd.xlane.f32.xlu0 %v261_v51  ;;  %329 = vadd.xlane.f32.xlu1 %v214_v52  ;;  %v505_v51 = vld [vmem:[%s980_s2] sm:$0xff] }
  0xa4   :  { %331 = vadd.xlane.f32.xlu0 %v215_v53  ;;  %333 = vadd.xlane.f32.xlu1 %v216_v54 }
  0xa8   :  { %335 = vadd.xlane.f32.xlu0 %v217_v55  ;;  %337 = vadd.xlane.f32.xlu1 %v218_v56  ;;  %v475_v55 = vld [vmem:[%s979_s1 + $0x10] sm:$0xff] }
  0xac   :  { %339 = vadd.xlane.f32.xlu0 %v219_v57  ;;  %341 = vadd.xlane.f32.xlu1 %v220_v58 }
  0xb0   :  { %343 = vadd.xlane.f32.xlu0 %v221_v59  ;;  %345 = vadd.xlane.f32.xlu1 %v222_v60 }
  0xb4   :  { %347 = vadd.xlane.f32.xlu0 %v223_v61  ;;  %349 = vadd.xlane.f32.xlu1 %v224_v62  ;;  %v474_v61 = vld [vmem:[%s979_s1 + $0x8] sm:$0xff] }
  0xb8   :  { %351 = vadd.xlane.f32.xlu0 %v225_v63  ;;  %353 = vadd.xlane.f32.xlu1 %v226_v0 }
  0xbc   :  { %355 = vadd.xlane.f32.xlu0 %v227_v1  ;;  %357 = vadd.xlane.f32.xlu1 %v228_v2  ;;  %v507_v1 = vld [vmem:[%s980_s2 + $0x10] sm:$0xff] }
  0xc0   :  { %359 = vadd.xlane.f32.xlu0 %v229_v3 }
 0x109   :  { %v378_v4 = vpop.xlane.xlu0 %377 }
 0x10a   :  { %564 = vrcp.f32 %v378_v4 }
 0x10d   :  { %v380_v5 = vpop.xlane.xlu1 %379  ;;  %v382_v6 = vpop.xlane.xlu0 %381 }
 0x10e   :  { %566 = vrcp.f32 %v380_v5  ;;  %v506_v5 = vld [vmem:[%s980_s2 + $0x8] sm:$0xff] }
 0x10f   :  { %568 = vrcp.f32 %v382_v6 }
 0x111   :  { %v386_v7 = vpop.xlane.xlu1 %385  ;;  %v384_v8 = vpop.xlane.xlu0 %383 }
 0x112   :  { %570 = vrcp.f32 %v386_v7 }
 0x113   :  { %572 = vrcp.f32 %v384_v8  ;;  %v477_v8 = vld [vmem:[%s979_s1 + $0x20] sm:$0xff] }
 0x115   :  { %v390_v9 = vpop.xlane.xlu1 %389  ;;  %v388_v10 = vpop.xlane.xlu0 %387 }
 0x116   :  { %574 = vrcp.f32 %v390_v9 }
 0x117   :  { %576 = vrcp.f32 %v388_v10  ;;  %v565_v19 = vpop.eup %564 }
 0x119   :  { %v394_v11 = vpop.xlane.xlu1 %393  ;;  %v392_v12 = vpop.xlane.xlu0 %391 }
 0x11a   :  { %578 = vrcp.f32 %v394_v11 }
 0x11b   :  { %580 = vrcp.f32 %v392_v12  ;;  %v567_v23 = vpop.eup %566 }
 0x11c   :  { %v569_v24 = vpop.eup %568 }
 0x11d   :  { %v398_v13 = vpop.xlane.xlu1 %397  ;;  %v396_v14 = vpop.xlane.xlu0 %395 }
 0x11f   :  { %v571_v29 = vpop.eup %570 }
 0x120   :  { %v573_v30 = vpop.eup %572 }
 0x121   :  { %v402_v15 = vpop.xlane.xlu1 %401  ;;  %v400_v16 = vpop.xlane.xlu0 %399 }
 0x123   :  { %v575_v35 = vpop.eup %574 }
 0x124   :  { %v577_v36 = vpop.eup %576 }
 0x125   :  { %v406_v17 = vpop.xlane.xlu1 %405  ;;  %v404_v18 = vpop.xlane.xlu0 %403 }
 0x127   :  { %v579_v41 = vpop.eup %578 }
 0x128   :  { %v581_v42 = vpop.eup %580 }
 0x129   :  { %v330_v20 = vpop.xlane.xlu1 %329  ;;  %v408_v21 = vpop.xlane.xlu0 %407 }
 0x12a   :  { %v410_v22 = vmul.f32 %v565_v19, %v330_v20  ;;  %v509_v19 = vld [vmem:[%s980_s2 + $0x20] sm:$0xff] }
 0x12c   :  { %582 = vlog2.f32 %v410_v22 }
 0x12d   :  { %v334_v25 = vpop.xlane.xlu1 %333  ;;  %v332_v26 = vpop.xlane.xlu0 %331  ;;  %584 = vrcp.f32 %v398_v13 }
 0x12e   :  { %v414_v27 = vmul.f32 %v569_v24, %v334_v25  ;;  %v412_v28 = vmul.f32 %v567_v23, %v332_v26  ;;  %586 = vrcp.f32 %v396_v14  ;;  %v476_v14 = vld [vmem:[%s979_s1 + $0x18] sm:$0xff]  ;;  %v479_v26 = vld [vmem:[%s979_s1 + $0x30] sm:$0xff] }
 0x12f   :  { %v508_v23 = vld [vmem:[%s980_s2 + $0x18] sm:$0xff] }
 0x130   :  { %588 = vlog2.f32 %v414_v27 }
 0x131   :  { %590 = vlog2.f32 %v412_v28  ;;  %v338_v31 = vpop.xlane.xlu1 %337  ;;  %v336_v32 = vpop.xlane.xlu0 %335 }
 0x132   :  { %592 = vrcp.f32 %v402_v15  ;;  %v418_v33 = vmul.f32 %v571_v29, %v338_v31  ;;  %v416_v34 = vmul.f32 %v573_v30, %v336_v32  ;;  %v478_v32 = vld [vmem:[%s979_s1 + $0x28] sm:$0xff] }
 0x133   :  { %594 = vrcp.f32 %v400_v16 }
 0x134   :  { %596 = vlog2.f32 %v418_v33 }
 0x135   :  { %598 = vlog2.f32 %v416_v34  ;;  %v342_v37 = vpop.xlane.xlu1 %341  ;;  %v340_v38 = vpop.xlane.xlu0 %339 }
 0x136   :  { %600 = vrcp.f32 %v406_v17  ;;  %v422_v39 = vmul.f32 %v575_v35, %v342_v37  ;;  %v420_v40 = vmul.f32 %v577_v36, %v340_v38  ;;  %v511_v36 = vld [vmem:[%s980_s2 + $0x30] sm:$0xff] }
 0x137   :  { %602 = vrcp.f32 %v404_v18 }
 0x138   :  { %604 = vlog2.f32 %v422_v39 }
 0x139   :  { %v583_v43 = vpop.eup %582  ;;  %606 = vlog2.f32 %v420_v40  ;;  %v346_v45 = vpop.xlane.xlu1 %345  ;;  %v510_v40 = vld [vmem:[%s980_s2 + $0x28] sm:$0xff] }
 0x13a   :  { %v344_v46 = vpop.xlane.xlu0 %343  ;;  %v442_v47 = vmul.f32 0.6931472, %v583_v43  ;;  %v426_v48 = vmul.f32 %v579_v41, %v346_v45  ;;  %v585_v50 = vpop.eup %584  ;;  %608 = vrcp.f32 %v408_v21  ;;  %v481_v43 = vld [vmem:[%s979_s1 + $0x40] sm:$0xff] }
 0x13b   :  { %v424_v49 = vmul.f32 %v581_v42, %v344_v46  ;;  %v587_v52 = vpop.eup %586 }
 0x13c   :  { %v489_v53 = vsub.f32 %v473_v44, %v442_v47  ;;  %610 = vlog2.f32 %v426_v48  ;;  %v480_v48 = vld [vmem:[%s979_s1 + $0x38] sm:$0xff] }
 0x13d   :  { %v589_v54 = vpop.eup %588  ;;  %612 = vlog2.f32 %v424_v49  ;;  %v350_v56 = vpop.xlane.xlu1 %349 }
 0x13e   :  { %v348_v57 = vpop.xlane.xlu0 %347  ;;  %v591_v58 = vpop.eup %590  ;;  %v521_v59 = vmul.f32 %v505_v51, %v489_v53  ;;  %v446_v60 = vmul.f32 0.6931472, %v589_v54  ;;  %v430_v62 = vmul.f32 %v585_v50, %v350_v56  ;;  %v513_v51 = vld [vmem:[%s980_s2 + $0x40] sm:$0xff]  ;;  %v512_v54 = vld [vmem:[%s980_s2 + $0x38] sm:$0xff] }
 0x13f   :  { %v428_v63 = vmul.f32 %v587_v52, %v348_v57  ;;  %v593_v0 = vpop.eup %592  ;;  %v444_v2 = vmul.f32 0.6931472, %v591_v58  ;;  %v483_v57 = vld [vmem:[%s979_s1 + $0x50] sm:$0xff] }
 0x140   :  { %v595_v3 = vpop.eup %594  ;;  %538 = vst.msk [vmem:[%s981_s5] sm:$0xff] %vm537_vm0, %v521_v59  ;;  %v491_v4 = vsub.f32 %v475_v55, %v446_v60  ;;  %614 = vlog2.f32 %v430_v62 }
 0x141   :  { %v597_v6 = vpop.eup %596  ;;  %v490_v7 = vsub.f32 %v474_v61, %v444_v2  ;;  %616 = vlog2.f32 %v428_v63  ;;  %v354_v9 = vpop.xlane.xlu1 %353  ;;  %v482_v61 = vld [vmem:[%s979_s1 + $0x48] sm:$0xff]  ;;  %v515_v63 = vld [vmem:[%s980_s2 + $0x50] sm:$0xff] }
 0x142   :  { %v352_v10 = vpop.xlane.xlu0 %351  ;;  %v599_v11 = vpop.eup %598  ;;  %v523_v12 = vmul.f32 %v507_v1, %v491_v4  ;;  %v450_v13 = vmul.f32 0.6931472, %v597_v6  ;;  %v434_v15 = vmul.f32 %v593_v0, %v354_v9  ;;  %v514_v2 = vld [vmem:[%s980_s2 + $0x48] sm:$0xff]  ;;  %v484_v9 = vld [vmem:[%s979_s1 + $0x58] sm:$0xff] }
 0x143   :  { %v432_v16 = vmul.f32 %v595_v3, %v352_v10  ;;  %v601_v17 = vpop.eup %600  ;;  %v522_v18 = vmul.f32 %v506_v5, %v490_v7  ;;  %v448_v20 = vmul.f32 0.6931472, %v599_v11  ;;  %v485_v5 = vld [vmem:[%s979_s1 + $0x60] sm:$0xff] }
 0x144   :  { %v603_v21 = vpop.eup %602  ;;  %540 = vst.msk [vmem:[%s981_s5 + $0x10] sm:$0xff] %vm537_vm0, %v523_v12  ;;  %v493_v22 = vsub.f32 %v477_v8, %v450_v13  ;;  %618 = vlog2.f32 %v434_v15  ;;  %v517_v11 = vld [vmem:[%s980_s2 + $0x60] sm:$0xff] }
 0x145   :  { %v605_v24 = vpop.eup %604  ;;  %539 = vst.msk [vmem:[%s981_s5 + $0x8] sm:$0xff] %vm537_vm0, %v522_v18  ;;  %v492_v25 = vsub.f32 %v476_v14, %v448_v20  ;;  %620 = vlog2.f32 %v432_v16  ;;  %v358_v27 = vpop.xlane.xlu1 %357  ;;  %v516_v14 = vld [vmem:[%s980_s2 + $0x58] sm:$0xff] }
 0x146   :  { %v356_v28 = vpop.xlane.xlu0 %355  ;;  %v607_v29 = vpop.eup %606  ;;  %v525_v30 = vmul.f32 %v509_v19, %v493_v22  ;;  %v454_v31 = vmul.f32 0.6931472, %v605_v24  ;;  %v438_v33 = vmul.f32 %v601_v17, %v358_v27  ;;  %v487_v17 = vld [vmem:[%s979_s1 + $0x70] sm:$0xff] }
 0x147   :  { %v436_v34 = vmul.f32 %v603_v21, %v356_v28  ;;  %v524_v35 = vmul.f32 %v508_v23, %v492_v25  ;;  %v452_v37 = vmul.f32 0.6931472, %v607_v29  ;;  %v609_v38 = vpop.eup %608  ;;  %v486_v21 = vld [vmem:[%s979_s1 + $0x68] sm:$0xff]  ;;  %v519_v23 = vld [vmem:[%s980_s2 + $0x70] sm:$0xff]  ;;  %v488_v29 = vld [vmem:[%s979_s1 + $0x78] sm:$0xff] }
 0x148   :  { %542 = vst.msk [vmem:[%s981_s5 + $0x20] sm:$0xff] %vm537_vm0, %v525_v30  ;;  %v495_v39 = vsub.f32 %v479_v26, %v454_v31  ;;  %622 = vlog2.f32 %v438_v33  ;;  %v518_v26 = vld [vmem:[%s980_s2 + $0x68] sm:$0xff]  ;;  %v520_v33 = vld [vmem:[%s980_s2 + $0x78] sm:$0xff] }
 0x149   :  { %v611_v41 = vpop.eup %610  ;;  %541 = vst.msk [vmem:[%s981_s5 + $0x18] sm:$0xff] %vm537_vm0, %v524_v35  ;;  %v494_v42 = vsub.f32 %v478_v32, %v452_v37  ;;  %624 = vlog2.f32 %v436_v34 }
 0x14a   :  { %v360_v44 = vpop.xlane.xlu0 %359  ;;  %v613_v45 = vpop.eup %612  ;;  %v527_v46 = vmul.f32 %v511_v36, %v495_v39  ;;  %v458_v47 = vmul.f32 0.6931472, %v611_v41 }
 0x14b   :  { %v440_v49 = vmul.f32 %v609_v38, %v360_v44  ;;  %v526_v50 = vmul.f32 %v510_v40, %v494_v42  ;;  %v456_v52 = vmul.f32 0.6931472, %v613_v45 }
 0x14c   :  { %544 = vst.msk [vmem:[%s981_s5 + $0x30] sm:$0xff] %vm537_vm0, %v527_v46  ;;  %v497_v53 = vsub.f32 %v481_v43, %v458_v47 }
 0x14d   :  { %626 = vlog2.f32 %v440_v49  ;;  %v615_v55 = vpop.eup %614  ;;  %543 = vst.msk [vmem:[%s981_s5 + $0x28] sm:$0xff] %vm537_vm0, %v526_v50  ;;  %v496_v56 = vsub.f32 %v480_v48, %v456_v52 }
 0x14e   :  { %v617_v58 = vpop.eup %616  ;;  %v529_v59 = vmul.f32 %v513_v51, %v497_v53  ;;  %v462_v60 = vmul.f32 0.6931472, %v615_v55 }
 0x14f   :  { %v528_v62 = vmul.f32 %v512_v54, %v496_v56  ;;  %v460_v0 = vmul.f32 0.6931472, %v617_v58 }
 0x150   :  { %546 = vst.msk [vmem:[%s981_s5 + $0x40] sm:$0xff] %vm537_vm0, %v529_v59  ;;  %v499_v1 = vsub.f32 %v483_v57, %v462_v60 }
 0x151   :  { %v619_v3 = vpop.eup %618  ;;  %545 = vst.msk [vmem:[%s981_s5 + $0x38] sm:$0xff] %vm537_vm0, %v528_v62  ;;  %v498_v4 = vsub.f32 %v482_v61, %v460_v0 }
 0x152   :  { %v621_v6 = vpop.eup %620  ;;  %v531_v7 = vmul.f32 %v515_v63, %v499_v1  ;;  %v466_v8 = vmul.f32 0.6931472, %v619_v3 }
 0x153   :  { %v530_v10 = vmul.f32 %v514_v2, %v498_v4  ;;  %v464_v12 = vmul.f32 0.6931472, %v621_v6 }
 0x154   :  { %548 = vst.msk [vmem:[%s981_s5 + $0x50] sm:$0xff] %vm537_vm0, %v531_v7  ;;  %v501_v13 = vsub.f32 %v485_v5, %v466_v8 }
 0x155   :  { %v623_v15 = vpop.eup %622  ;;  %547 = vst.msk [vmem:[%s981_s5 + $0x48] sm:$0xff] %vm537_vm0, %v530_v10  ;;  %v500_v16 = vsub.f32 %v484_v9, %v464_v12 }
 0x156   :  { %v625_v18 = vpop.eup %624  ;;  %v533_v19 = vmul.f32 %v517_v11, %v501_v13  ;;  %v470_v20 = vmul.f32 0.6931472, %v623_v15 }
 0x157   :  { %v532_v22 = vmul.f32 %v516_v14, %v500_v16  ;;  %v468_v24 = vmul.f32 0.6931472, %v625_v18 }
 0x158   :  { %550 = vst.msk [vmem:[%s981_s5 + $0x60] sm:$0xff] %vm537_vm0, %v533_v19  ;;  %v503_v25 = vsub.f32 %v487_v17, %v470_v20 }
 0x159   :  { %549 = vst.msk [vmem:[%s981_s5 + $0x58] sm:$0xff] %vm537_vm0, %v532_v22  ;;  %v502_v28 = vsub.f32 %v486_v21, %v468_v24 }
 0x15a   :  { %v627_v27 = vpop.eup %626  ;;  %v535_v30 = vmul.f32 %v519_v23, %v503_v25 }
 0x15b   :  { %v472_v31 = vmul.f32 0.6931472, %v627_v27  ;;  %v534_v32 = vmul.f32 %v518_v26, %v502_v28 }
 0x15c   :  { %552 = vst.msk [vmem:[%s981_s5 + $0x70] sm:$0xff] %vm537_vm0, %v535_v30 }
 0x15d   :  { %v504_v34 = vsub.f32 %v488_v29, %v472_v31  ;;  %551 = vst.msk [vmem:[%s981_s5 + $0x68] sm:$0xff] %vm537_vm0, %v534_v32 }
 0x15f   :  { %v536_v35 = vmul.f32 %v520_v33, %v504_v34 }
 0x161   :  { %553 = vst.msk [vmem:[%s981_s5 + $0x78] sm:$0xff] %vm537_vm0, %v536_v35 }

</bundles_post_ra>
